<compile_context>
chip_gen: v7x
topology: tpu7x:2x2x1
jax: 0.10.0
libtpu: 0.0.40
codegen_flags: <defaults>
</compile_context>

<pallas_src>
import functools

import jax
import jax.numpy as jnp
from jax import lax
from jax.experimental import pallas as pl
from jax.experimental.pallas import tpu as pltpu


def mha_kernel(x_ref, wqkv_ref, bqkv_ref, wp_ref, bp_ref, o_ref,
               qkv_ref, ho_ref, *, num_heads, scale):
    """One grid step = one batch element, ALL heads.

    Faithful to the reference module: scores = k @ q^T, softmax over the last
    axis, and the 1/sqrt(hd) scale applied AFTER the softmax.
    """
    hidden = ho_ref.shape[-1]
    hd = hidden // num_heads

    x = x_ref[0]                                   # (N, D) bf16

    # (1) One lane-dense QKV projection for all heads (bf16 MXU, f32 acc + bias).
    #     Column ordering of Wqkv^T matches the reference reshape (3, H, hd):
    #     q_h -> [h*hd, (h+1)*hd), k_h -> hidden + ..., v_h -> 2*hidden + ...
    qkv_ref[...] = (
        jnp.dot(x, wqkv_ref[...], preferred_element_type=jnp.float32)
        + bqkv_ref[...])                           # (N, 3*hidden) f32

    # (2) Per-head attention. Heads are unrolled (H is small) with static lane
    #     slices of the VMEM qkv scratch — no per-head weight DMAs, no narrow
    #     projection matmuls.
    for h in range(num_heads):
        q = qkv_ref[:, h * hd:(h + 1) * hd]                            # (N, hd) f32
        k = qkv_ref[:, hidden + h * hd:hidden + (h + 1) * hd]          # (N, hd) f32
        v = qkv_ref[:, 2 * hidden + h * hd:2 * hidden + (h + 1) * hd]  # (N, hd) f32

        # scores = k @ q^T: contract the last dim of both operands so the MXU
        # takes the transposed operand natively (no explicit XLU transpose).
        scores = lax.dot_general(
            k.astype(jnp.bfloat16), q.astype(jnp.bfloat16),
            dimension_numbers=(((1,), (1,)), ((), ())),
            preferred_element_type=jnp.float32)                        # (N, N) f32

        # Softmax in f32; divide replaced by EUP approx reciprocal on the (N, 1)
        # denominator with the post-softmax `scale` folded in.
        m = jnp.max(scores, axis=-1, keepdims=True)
        e = jnp.exp(scores - m)
        denom = jnp.sum(e, axis=-1, keepdims=True)
        attn = e * (scale * pl.reciprocal(denom, approx=True))         # (N, N) f32

        # attn @ v (bf16 only at the MXU boundary), head output into the
        # concat scratch at this head's column slot.
        ho_ref[:, h * hd:(h + 1) * hd] = jnp.dot(
            attn.astype(jnp.bfloat16), v.astype(jnp.bfloat16),
            preferred_element_type=jnp.float32)                        # (N, hd) f32

    # (3) Single lane-dense output projection over the concatenated heads
    #     (full contraction depth `hidden`, output width padded to >=128 lanes).
    out = (jnp.dot(ho_ref[...].astype(jnp.bfloat16), wp_ref[...],
                   preferred_element_type=jnp.float32) + bp_ref[...])  # (N, hidden_pad)
    o_ref[0] = out.astype(o_ref.dtype)


def multi_head_attention(x, wqkv_t, bqkv, wproj_t, bproj, *, num_heads, scale=None):
    """x: (B, N, D) f32. wqkv_t: (D, 3*hidden) = Wqkv^T. wproj_t: (hidden, hidden) = Wproj^T."""
    B, N, D = x.shape
    hidden = wproj_t.shape[0]
    hd = hidden // num_heads
    scale = scale if scale is not None else hd ** (-0.5)

    # ---- One-time wrapper-side layout prep (plain XLA, outside the kernel) ----
    # Pad the projection output to a multiple of 128 lanes so the kernel's output
    # store is unmasked / lane-dense; sliced off below (no-op for hidden % 128 == 0).
    hidden_pad = ((hidden + 127) // 128) * 128
    wp_pad = jnp.zeros((hidden, hidden_pad), jnp.bfloat16)
    wp_pad = wp_pad.at[:, :hidden].set(wproj_t.astype(jnp.bfloat16))
    bp_pad = jnp.zeros((1, hidden_pad), jnp.float32)
    bp_pad = bp_pad.at[:, :hidden].set(bproj.astype(jnp.float32))

    x_bf = x.astype(jnp.bfloat16)                       # bf16 MXU operands
    wqkv_bf = wqkv_t.astype(jnp.bfloat16)               # (D, 3*hidden) bf16
    bqkv_f = bqkv.reshape(1, 3 * hidden).astype(jnp.float32)

    kernel = functools.partial(mha_kernel, num_heads=num_heads, scale=scale)

    out_pad = pl.pallas_call(
        kernel,
        out_shape=jax.ShapeDtypeStruct((B, N, hidden_pad), x.dtype),
        grid_spec=pltpu.PrefetchScalarGridSpec(
            num_scalar_prefetch=0,
            grid=(B,),                                         # one step per batch element
            in_specs=[
                pl.BlockSpec((1, N, D), lambda b: (b, 0, 0)),         # x[b]
                # Grid-resident weights/biases: constant index maps -> DMA'd once.
                pl.BlockSpec((D, 3 * hidden), lambda b: (0, 0)),      # Wqkv^T (all heads)
                pl.BlockSpec((1, 3 * hidden), lambda b: (0, 0)),      # bqkv
                pl.BlockSpec((hidden, hidden_pad), lambda b: (0, 0)), # Wproj^T (padded)
                pl.BlockSpec((1, hidden_pad), lambda b: (0, 0)),      # bproj (padded)
            ],
            out_specs=pl.BlockSpec((1, N, hidden_pad), lambda b: (b, 0, 0)),
            scratch_shapes=[
                pltpu.VMEM((N, 3 * hidden), jnp.float32),  # all-head qkv projection
                pltpu.VMEM((N, hidden), jnp.float32),      # concatenated head outputs
            ],
        ),
        compiler_params=pltpu.CompilerParams(
            # Batch axis is embarrassingly parallel -> shards across TCs on v7x.
            dimension_semantics=("parallel",)),
    )(x_bf, wqkv_bf, bqkv_f, wp_pad, bp_pad)

    return out_pad[:, :, :hidden]


def reference_mha(x, wqkv_t, bqkv, wproj_t, bproj, *, num_heads, scale=None):
    """Pure-JAX f32 mirror of the PyTorch forward (for correctness checking)."""
    B, N, D = x.shape
    hidden = wproj_t.shape[0]
    hd = hidden // num_heads
    scale = scale if scale is not None else hd ** (-0.5)
    qkv = x @ wqkv_t + bqkv                                   # (B, N, 3*hidden)
    qkv = qkv.reshape(B, N, 3, num_heads, hd).transpose(2, 0, 3, 1, 4)
    q, k, v = qkv[0], qkv[1], qkv[2]                          # (B, H, N, hd)
    scores = jnp.einsum("bhnd,bhmd->bhnm", k, q)              # k @ q^T
    attn = jax.nn.softmax(scores, axis=-1) * scale
    out = jnp.einsum("bhnm,bhmd->bhnd", attn, v)              # (B, H, N, hd)
    out = out.transpose(0, 2, 1, 3).reshape(B, N, hidden)
    return out @ wproj_t + bproj


if __name__ == "__main__":
    # Small config consistent with the module: hidden=32, heads=4 -> head_dims=8.
    B, N = 2, 8
    num_heads, hidden = 4, 32
    input_dims = hidden

    key = jax.random.PRNGKey(0)
    kx, k1, k2, k3, k4 = jax.random.split(key, 5)

    x = jax.random.normal(kx, (B, N, input_dims), dtype=jnp.float32)

    # Deterministic "Linear" parameters. Stored as (in, out) = W^T.
    wqkv_t = 0.05 * jax.random.normal(k1, (input_dims, 3 * hidden), dtype=jnp.float32)
    bqkv = 0.05 * jax.random.normal(k2, (3 * hidden,), dtype=jnp.float32)
    wproj_t = 0.05 * jax.random.normal(k3, (hidden, hidden), dtype=jnp.float32)
    bproj = 0.05 * jax.random.normal(k4, (hidden,), dtype=jnp.float32)

    out = multi_head_attention(x, wqkv_t, bqkv, wproj_t, bproj, num_heads=num_heads)
    out = jax.block_until_ready(out)

    ref = reference_mha(x, wqkv_t, bqkv, wproj_t, bproj, num_heads=num_heads)
    assert out.shape == (B, N, hidden)
    # Tolerance accounts for bf16 MXU operands + EUP approx reciprocal vs f32 reference.
    assert jnp.allclose(out, ref, atol=5e-3, rtol=5e-2), "mismatch vs pure-JAX reference"

    print("KERNEL_OK")
</pallas_src>

<mosaic_0001>
module attributes {stable_mosaic.version = 11 : i64} {
  func.func @mha_kernel(%arg0: i32, %arg1: memref<1x8x32xbf16, #tpu.memory_space<vmem>>, %arg2: memref<32x96xbf16, #tpu.memory_space<vmem>>, %arg3: memref<1x96xf32, #tpu.memory_space<vmem>>, %arg4: memref<32x128xbf16, #tpu.memory_space<vmem>>, %arg5: memref<1x128xf32, #tpu.memory_space<vmem>>, %arg6: memref<1x8x128xf32, #tpu.memory_space<vmem>>, %arg7: memref<8x96xf32, #tpu.memory_space<vmem>>, %arg8: memref<8x32xf32, #tpu.memory_space<vmem>>) attributes {dimension_semantics = [#tpu.dimension_semantics<parallel>], iteration_bounds = array<i64: 2>, scalar_prefetch = 0 : i64, scratch_operands = 2 : i64, tpu.core_type = #tpu.core_type<tc>, window_params = [{transform_indices = @transform_0, window_bounds = array<i64: 1, 8, 32>}, {pipeline_mode = #tpu.pipeline_mode<synchronous>, transform_indices = @transform_1, window_bounds = array<i64: 32, 96>}, {pipeline_mode = #tpu.pipeline_mode<synchronous>, transform_indices = @transform_2, window_bounds = array<i64: 1, 96>}, {pipeline_mode = #tpu.pipeline_mode<synchronous>, transform_indices = @transform_3, window_bounds = array<i64: 32, 128>}, {pipeline_mode = #tpu.pipeline_mode<synchronous>, transform_indices = @transform_4, window_bounds = array<i64: 1, 128>}, {transform_indices = @transform_5, window_bounds = array<i64: 1, 8, 128>}]} {
    %c0 = arith.constant 0 : index
    %c0_0 = arith.constant 0 : index
    %c0_1 = arith.constant 0 : index
    %0 = vector.load %arg1[%c0, %c0_0, %c0_1] : memref<1x8x32xbf16, #tpu.memory_space<vmem>>, vector<1x8x32xbf16>
    %1 = vector.shape_cast %0 : vector<1x8x32xbf16> to vector<8x32xbf16>
    %c0_2 = arith.constant 0 : index
    %c0_3 = arith.constant 0 : index
    %2 = vector.load %arg2[%c0_2, %c0_3] : memref<32x96xbf16, #tpu.memory_space<vmem>>, vector<32x96xbf16>
    %cst = arith.constant dense<0.000000e+00> : vector<8x96xf32>
    %3 = tpu.matmul %1, %2, %cst {dimension_numbers = #tpu.dot_dimension_numbers<[1], [0], [0], [1], [0, 0, 1, 1], [], []>} : vector<8x32xbf16>, vector<32x96xbf16>, vector<8x96xf32> -> vector<8x96xf32>
    %c0_4 = arith.constant 0 : index
    %c0_5 = arith.constant 0 : index
    %4 = vector.load %arg3[%c0_4, %c0_5] : memref<1x96xf32, #tpu.memory_space<vmem>>, vector<1x96xf32>
    %5 = vector.broadcast %4 : vector<1x96xf32> to vector<8x96xf32>
    %6 = arith.addf %3, %5 : vector<8x96xf32>
    %c0_6 = arith.constant 0 : index
    %c0_7 = arith.constant 0 : index
    %7 = vector.load %arg7[%c0_6, %c0_7] : memref<8x96xf32, #tpu.memory_space<vmem>>, vector<8x96xf32>
    tpu.vector_store %arg7[%c0_6, %c0_7], %6 {strides = array<i32>} : memref<8x96xf32, #tpu.memory_space<vmem>>, vector<8x96xf32>,
    %c0_8 = arith.constant 0 : index
    %c0_9 = arith.constant 0 : index
    %8 = vector.load %arg7[%c0_8, %c0_9] : memref<8x96xf32, #tpu.memory_space<vmem>>, vector<8x8xf32>
    %c0_10 = arith.constant 0 : index
    %c32 = arith.constant 32 : index
    %9 = vector.load %arg7[%c0_10, %c32] : memref<8x96xf32, #tpu.memory_space<vmem>>, vector<8x8xf32>
    %c0_11 = arith.constant 0 : index
    %c64 = arith.constant 64 : index
    %10 = vector.load %arg7[%c0_11, %c64] : memref<8x96xf32, #tpu.memory_space<vmem>>, vector<8x8xf32>
    %11 = arith.truncf %9 : vector<8x8xf32> to vector<8x8xbf16>
    %12 = arith.truncf %8 : vector<8x8xf32> to vector<8x8xbf16>
    %cst_12 = arith.constant dense<0.000000e+00> : vector<8x8xf32>
    %13 = tpu.matmul %11, %12, %cst_12 {dimension_numbers = #tpu.dot_dimension_numbers<[1], [1], [0], [0], [0, 0, 1, 0], [], []>} : vector<8x8xbf16>, vector<8x8xbf16>, vector<8x8xf32> -> vector<8x8xf32>
    %cst_13 = arith.constant dense<0xFF800000> : vector<8xf32>
    %14 = vector.multi_reduction <maximumf>, %13, %cst_13 [1] : vector<8x8xf32> to vector<8xf32>
    %15 = vector.shape_cast %14 : vector<8xf32> to vector<8x1xf32>
    %16 = vector.broadcast %15 : vector<8x1xf32> to vector<8x8xf32>
    %17 = arith.subf %13, %16 : vector<8x8xf32>
    %18 = math.exp %17 : vector<8x8xf32>
    %cst_14 = arith.constant dense<0.000000e+00> : vector<8xf32>
    %19 = vector.multi_reduction <add>, %18, %cst_14 [1] : vector<8x8xf32> to vector<8xf32>
    %20 = vector.shape_cast %19 : vector<8xf32> to vector<8x1xf32>
    %21 = tpu.reciprocal %20 {approx = true} : vector<8x1xf32> -> vector<8x1xf32>
    %cst_15 = arith.constant 0.353553385 : f32
    %22 = vector.broadcast %cst_15 : f32 to vector<8x1xf32>
    %23 = arith.mulf %22, %21 : vector<8x1xf32>
    %24 = vector.broadcast %23 : vector<8x1xf32> to vector<8x8xf32>
    %25 = arith.mulf %18, %24 : vector<8x8xf32>
    %26 = arith.truncf %25 : vector<8x8xf32> to vector<8x8xbf16>
    %27 = arith.truncf %10 : vector<8x8xf32> to vector<8x8xbf16>
    %cst_16 = arith.constant dense<0.000000e+00> : vector<8x8xf32>
    %28 = tpu.matmul %26, %27, %cst_16 {dimension_numbers = #tpu.dot_dimension_numbers<[1], [0], [0], [1], [0, 0, 1, 1], [], []>} : vector<8x8xbf16>, vector<8x8xbf16>, vector<8x8xf32> -> vector<8x8xf32>
    %c0_17 = arith.constant 0 : index
    %c0_18 = arith.constant 0 : index
    %29 = vector.load %arg8[%c0_17, %c0_18] : memref<8x32xf32, #tpu.memory_space<vmem>>, vector<8x8xf32>
    tpu.vector_store %arg8[%c0_17, %c0_18], %28 {strides = array<i32>} : memref<8x32xf32, #tpu.memory_space<vmem>>, vector<8x8xf32>,
    %c0_19 = arith.constant 0 : index
    %c8 = arith.constant 8 : index
    %30 = vector.load %arg7[%c0_19, %c8] : memref<8x96xf32, #tpu.memory_space<vmem>>, vector<8x8xf32>
    %c0_20 = arith.constant 0 : index
    %c40 = arith.constant 40 : index
    %31 = vector.load %arg7[%c0_20, %c40] : memref<8x96xf32, #tpu.memory_space<vmem>>, vector<8x8xf32>
    %c0_21 = arith.constant 0 : index
    %c72 = arith.constant 72 : index
    %32 = vector.load %arg7[%c0_21, %c72] : memref<8x96xf32, #tpu.memory_space<vmem>>, vector<8x8xf32>
    %33 = arith.truncf %31 : vector<8x8xf32> to vector<8x8xbf16>
    %34 = arith.truncf %30 : vector<8x8xf32> to vector<8x8xbf16>
    %cst_22 = arith.constant dense<0.000000e+00> : vector<8x8xf32>
    %35 = tpu.matmul %33, %34, %cst_22 {dimension_numbers = #tpu.dot_dimension_numbers<[1], [1], [0], [0], [0, 0, 1, 0], [], []>} : vector<8x8xbf16>, vector<8x8xbf16>, vector<8x8xf32> -> vector<8x8xf32>
    %cst_23 = arith.constant dense<0xFF800000> : vector<8xf32>
    %36 = vector.multi_reduction <maximumf>, %35, %cst_23 [1] : vector<8x8xf32> to vector<8xf32>
    %37 = vector.shape_cast %36 : vector<8xf32> to vector<8x1xf32>
    %38 = vector.broadcast %37 : vector<8x1xf32> to vector<8x8xf32>
    %39 = arith.subf %35, %38 : vector<8x8xf32>
    %40 = math.exp %39 : vector<8x8xf32>
    %cst_24 = arith.constant dense<0.000000e+00> : vector<8xf32>
    %41 = vector.multi_reduction <add>, %40, %cst_24 [1] : vector<8x8xf32> to vector<8xf32>
    %42 = vector.shape_cast %41 : vector<8xf32> to vector<8x1xf32>
    %43 = tpu.reciprocal %42 {approx = true} : vector<8x1xf32> -> vector<8x1xf32>
    %cst_25 = arith.constant 0.353553385 : f32
    %44 = vector.broadcast %cst_25 : f32 to vector<8x1xf32>
    %45 = arith.mulf %44, %43 : vector<8x1xf32>
    %46 = vector.broadcast %45 : vector<8x1xf32> to vector<8x8xf32>
    %47 = arith.mulf %40, %46 : vector<8x8xf32>
    %48 = arith.truncf %47 : vector<8x8xf32> to vector<8x8xbf16>
    %49 = arith.truncf %32 : vector<8x8xf32> to vector<8x8xbf16>
    %cst_26 = arith.constant dense<0.000000e+00> : vector<8x8xf32>
    %50 = tpu.matmul %48, %49, %cst_26 {dimension_numbers = #tpu.dot_dimension_numbers<[1], [0], [0], [1], [0, 0, 1, 1], [], []>} : vector<8x8xbf16>, vector<8x8xbf16>, vector<8x8xf32> -> vector<8x8xf32>
    %c0_27 = arith.constant 0 : index
    %c8_28 = arith.constant 8 : index
    %51 = vector.load %arg8[%c0_27, %c8_28] : memref<8x32xf32, #tpu.memory_space<vmem>>, vector<8x8xf32>
    tpu.vector_store %arg8[%c0_27, %c8_28], %50 {strides = array<i32>} : memref<8x32xf32, #tpu.memory_space<vmem>>, vector<8x8xf32>,
    %c0_29 = arith.constant 0 : index
    %c16 = arith.constant 16 : index
    %52 = vector.load %arg7[%c0_29, %c16] : memref<8x96xf32, #tpu.memory_space<vmem>>, vector<8x8xf32>
    %c0_30 = arith.constant 0 : index
    %c48 = arith.constant 48 : index
    %53 = vector.load %arg7[%c0_30, %c48] : memref<8x96xf32, #tpu.memory_space<vmem>>, vector<8x8xf32>
    %c0_31 = arith.constant 0 : index
    %c80 = arith.constant 80 : index
    %54 = vector.load %arg7[%c0_31, %c80] : memref<8x96xf32, #tpu.memory_space<vmem>>, vector<8x8xf32>
    %55 = arith.truncf %53 : vector<8x8xf32> to vector<8x8xbf16>
    %56 = arith.truncf %52 : vector<8x8xf32> to vector<8x8xbf16>
    %cst_32 = arith.constant dense<0.000000e+00> : vector<8x8xf32>
    %57 = tpu.matmul %55, %56, %cst_32 {dimension_numbers = #tpu.dot_dimension_numbers<[1], [1], [0], [0], [0, 0, 1, 0], [], []>} : vector<8x8xbf16>, vector<8x8xbf16>, vector<8x8xf32> -> vector<8x8xf32>
    %cst_33 = arith.constant dense<0xFF800000> : vector<8xf32>
    %58 = vector.multi_reduction <maximumf>, %57, %cst_33 [1] : vector<8x8xf32> to vector<8xf32>
    %59 = vector.shape_cast %58 : vector<8xf32> to vector<8x1xf32>
    %60 = vector.broadcast %59 : vector<8x1xf32> to vector<8x8xf32>
    %61 = arith.subf %57, %60 : vector<8x8xf32>
    %62 = math.exp %61 : vector<8x8xf32>
    %cst_34 = arith.constant dense<0.000000e+00> : vector<8xf32>
    %63 = vector.multi_reduction <add>, %62, %cst_34 [1] : vector<8x8xf32> to vector<8xf32>
    %64 = vector.shape_cast %63 : vector<8xf32> to vector<8x1xf32>
    %65 = tpu.reciprocal %64 {approx = true} : vector<8x1xf32> -> vector<8x1xf32>
    %cst_35 = arith.constant 0.353553385 : f32
    %66 = vector.broadcast %cst_35 : f32 to vector<8x1xf32>
    %67 = arith.mulf %66, %65 : vector<8x1xf32>
    %68 = vector.broadcast %67 : vector<8x1xf32> to vector<8x8xf32>
    %69 = arith.mulf %62, %68 : vector<8x8xf32>
    %70 = arith.truncf %69 : vector<8x8xf32> to vector<8x8xbf16>
    %71 = arith.truncf %54 : vector<8x8xf32> to vector<8x8xbf16>
    %cst_36 = arith.constant dense<0.000000e+00> : vector<8x8xf32>
    %72 = tpu.matmul %70, %71, %cst_36 {dimension_numbers = #tpu.dot_dimension_numbers<[1], [0], [0], [1], [0, 0, 1, 1], [], []>} : vector<8x8xbf16>, vector<8x8xbf16>, vector<8x8xf32> -> vector<8x8xf32>
    %c0_37 = arith.constant 0 : index
    %c16_38 = arith.constant 16 : index
    %73 = vector.load %arg8[%c0_37, %c16_38] : memref<8x32xf32, #tpu.memory_space<vmem>>, vector<8x8xf32>
    tpu.vector_store %arg8[%c0_37, %c16_38], %72 {strides = array<i32>} : memref<8x32xf32, #tpu.memory_space<vmem>>, vector<8x8xf32>,
    %c0_39 = arith.constant 0 : index
    %c24 = arith.constant 24 : index
    %74 = vector.load %arg7[%c0_39, %c24] : memref<8x96xf32, #tpu.memory_space<vmem>>, vector<8x8xf32>
    %c0_40 = arith.constant 0 : index
    %c56 = arith.constant 56 : index
    %75 = vector.load %arg7[%c0_40, %c56] : memref<8x96xf32, #tpu.memory_space<vmem>>, vector<8x8xf32>
    %c0_41 = arith.constant 0 : index
    %c88 = arith.constant 88 : index
    %76 = vector.load %arg7[%c0_41, %c88] : memref<8x96xf32, #tpu.memory_space<vmem>>, vector<8x8xf32>
    %77 = arith.truncf %75 : vector<8x8xf32> to vector<8x8xbf16>
    %78 = arith.truncf %74 : vector<8x8xf32> to vector<8x8xbf16>
    %cst_42 = arith.constant dense<0.000000e+00> : vector<8x8xf32>
    %79 = tpu.matmul %77, %78, %cst_42 {dimension_numbers = #tpu.dot_dimension_numbers<[1], [1], [0], [0], [0, 0, 1, 0], [], []>} : vector<8x8xbf16>, vector<8x8xbf16>, vector<8x8xf32> -> vector<8x8xf32>
    %cst_43 = arith.constant dense<0xFF800000> : vector<8xf32>
    %80 = vector.multi_reduction <maximumf>, %79, %cst_43 [1] : vector<8x8xf32> to vector<8xf32>
    %81 = vector.shape_cast %80 : vector<8xf32> to vector<8x1xf32>
    %82 = vector.broadcast %81 : vector<8x1xf32> to vector<8x8xf32>
    %83 = arith.subf %79, %82 : vector<8x8xf32>
    %84 = math.exp %83 : vector<8x8xf32>
    %cst_44 = arith.constant dense<0.000000e+00> : vector<8xf32>
    %85 = vector.multi_reduction <add>, %84, %cst_44 [1] : vector<8x8xf32> to vector<8xf32>
    %86 = vector.shape_cast %85 : vector<8xf32> to vector<8x1xf32>
    %87 = tpu.reciprocal %86 {approx = true} : vector<8x1xf32> -> vector<8x1xf32>
    %cst_45 = arith.constant 0.353553385 : f32
    %88 = vector.broadcast %cst_45 : f32 to vector<8x1xf32>
    %89 = arith.mulf %88, %87 : vector<8x1xf32>
    %90 = vector.broadcast %89 : vector<8x1xf32> to vector<8x8xf32>
    %91 = arith.mulf %84, %90 : vector<8x8xf32>
    %92 = arith.truncf %91 : vector<8x8xf32> to vector<8x8xbf16>
    %93 = arith.truncf %76 : vector<8x8xf32> to vector<8x8xbf16>
    %cst_46 = arith.constant dense<0.000000e+00> : vector<8x8xf32>
    %94 = tpu.matmul %92, %93, %cst_46 {dimension_numbers = #tpu.dot_dimension_numbers<[1], [0], [0], [1], [0, 0, 1, 1], [], []>} : vector<8x8xbf16>, vector<8x8xbf16>, vector<8x8xf32> -> vector<8x8xf32>
    %c0_47 = arith.constant 0 : index
    %c24_48 = arith.constant 24 : index
    %95 = vector.load %arg8[%c0_47, %c24_48] : memref<8x32xf32, #tpu.memory_space<vmem>>, vector<8x8xf32>
    tpu.vector_store %arg8[%c0_47, %c24_48], %94 {strides = array<i32>} : memref<8x32xf32, #tpu.memory_space<vmem>>, vector<8x8xf32>,
    %c0_49 = arith.constant 0 : index
    %c0_50 = arith.constant 0 : index
    %96 = vector.load %arg8[%c0_49, %c0_50] : memref<8x32xf32, #tpu.memory_space<vmem>>, vector<8x32xf32>
    %97 = arith.truncf %96 : vector<8x32xf32> to vector<8x32xbf16>
    %c0_51 = arith.constant 0 : index
    %c0_52 = arith.constant 0 : index
    %98 = vector.load %arg4[%c0_51, %c0_52] : memref<32x128xbf16, #tpu.memory_space<vmem>>, vector<32x128xbf16>
    %cst_53 = arith.constant dense<0.000000e+00> : vector<8x128xf32>
    %99 = tpu.matmul %97, %98, %cst_53 {dimension_numbers = #tpu.dot_dimension_numbers<[1], [0], [0], [1], [0, 0, 1, 1], [], []>} : vector<8x32xbf16>, vector<32x128xbf16>, vector<8x128xf32> -> vector<8x128xf32>
    %c0_54 = arith.constant 0 : index
    %c0_55 = arith.constant 0 : index
    %100 = vector.load %arg5[%c0_54, %c0_55] : memref<1x128xf32, #tpu.memory_space<vmem>>, vector<1x128xf32>
    %101 = vector.broadcast %100 : vector<1x128xf32> to vector<8x128xf32>
    %102 = arith.addf %99, %101 : vector<8x128xf32>
    %c0_56 = arith.constant 0 : index
    %c0_57 = arith.constant 0 : index
    %c0_58 = arith.constant 0 : index
    %103 = vector.load %arg6[%c0_56, %c0_57, %c0_58] : memref<1x8x128xf32, #tpu.memory_space<vmem>>, vector<1x8x128xf32>
    %104 = vector.shape_cast %103 : vector<1x8x128xf32> to vector<8x128xf32>
    %105 = vector.shape_cast %102 : vector<8x128xf32> to vector<1x8x128xf32>
    tpu.vector_store %arg6[%c0_56, %c0_57, %c0_58], %105 {strides = array<i32>} : memref<1x8x128xf32, #tpu.memory_space<vmem>>, vector<1x8x128xf32>,
    return
  }
  func.func @transform_0(%arg0: i32) -> (i32, i32, i32) {
    %c0_i32 = arith.constant 0 : i32
    %c0_i32_0 = arith.constant 0 : i32
    %c0_i32_1 = arith.constant 0 : i32
    return %arg0, %c0_i32, %c0_i32_0 : i32, i32, i32
  }
  func.func @transform_1(%arg0: i32) -> (i32, i32) {
    %c0_i32 = arith.constant 0 : i32
    %c0_i32_0 = arith.constant 0 : i32
    %c0_i32_1 = arith.constant 0 : i32
    return %c0_i32, %c0_i32_0 : i32, i32
  }
  func.func @transform_2(%arg0: i32) -> (i32, i32) {
    %c0_i32 = arith.constant 0 : i32
    %c0_i32_0 = arith.constant 0 : i32
    %c0_i32_1 = arith.constant 0 : i32
    return %c0_i32, %c0_i32_0 : i32, i32
  }
  func.func @transform_3(%arg0: i32) -> (i32, i32) {
    %c0_i32 = arith.constant 0 : i32
    %c0_i32_0 = arith.constant 0 : i32
    %c0_i32_1 = arith.constant 0 : i32
    return %c0_i32, %c0_i32_0 : i32, i32
  }
  func.func @transform_4(%arg0: i32) -> (i32, i32) {
    %c0_i32 = arith.constant 0 : i32
    %c0_i32_0 = arith.constant 0 : i32
    %c0_i32_1 = arith.constant 0 : i32
    return %c0_i32, %c0_i32_0 : i32, i32
  }
  func.func @transform_5(%arg0: i32) -> (i32, i32, i32) {
    %c0_i32 = arith.constant 0 : i32
    %c0_i32_0 = arith.constant 0 : i32
    %c0_i32_1 = arith.constant 0 : i32
    return %arg0, %c0_i32, %c0_i32_0 : i32, i32, i32
  }
}

</mosaic_0001>

<bundles_post_ra>
// kernel: tpu_custom_call.1
= control target key start
LH: loop header
LB: loop body
LE: loop exit
PB: predicated region body
PF: predicated region fallthrough
CT: control target
= control target key end

     0   :  { %10 = vsyncpa [#allocation5], 0  ;;  %s1729_s0 = inlined_call_operand.hbm [shape: bf16[2,8,32], index: 0, kind: input, shape index: {}]   ;;  %s1730_s1 = inlined_call_operand.hbm [shape: bf16[32,96], index: 1, kind: input, shape index: {}]   ;;  %s1731_s2 = inlined_call_operand.vmem [shape: f32[1,96], index: 2, kind: input, shape index: {}]   ;;  %s1732_s3 = inlined_call_operand.hbm [shape: bf16[32,128], index: 3, kind: input, shape index: {}]   ;;  %s1733_s4 = inlined_call_operand.vmem [shape: f32[1,128], index: 4, kind: input, shape index: {}]   ;;  %s1734_s5 = inlined_call_operand.hbm [shape: f32[2,8,128], index: 5, kind: output, shape index: {}]  }
   0x1   :  { %12 = vsyncpa [#allocation5 + $0x1], 0 }
   0x2   :  { %13 = vsyncpa [#allocation8], 0 }
   0x3   :  { %14 = vsyncpa [#allocation6], 0 }
   0x4   :  { %16 = vsyncpa [#allocation6 + $0x1], 0  ;;  %s1420_s18 = smov 0   ;;  %s1422_s19 = smov 0  }
   0x5   :  { %s1424_s20 = smov 0   ;;  %s1426_s21 = smov 0  }
   0x6 LB: > { %s1441_s22 = sadd.s32 4294967295, %s1366_s21   ;;  %s987_s23 = sadd.s32 4294967294, %s1366_s21   ;;  %s1366_s21 = sphi %s1426_s21, %s1754_s21   ;;  %s1362_s20 = sphi %s1424_s20, %s1753_s20   ;;  %s1358_s19 = sphi %s1422_s19, %s1752_s19   ;;  %s1354_s18 = sphi %s1420_s18, %s1751_s18  }
   0x7   : > { %p42_p0 = scmp.ne.s32.totalorder %s1358_s19, %s1354_s18  ;;  %p1735_p1 = scmp.eq.s32.totalorder %s1441_s22, 0 }
   0x8   : > { %p156_p3 = scmp.eq.s32.totalorder %s987_s23, 1  ;;  %p988_p5 = scmp.ge.s32.totalorder %s1366_s21, 1 }
   0x9   : > { %p1450_p4 = por %p1735_p1, %p42_p0  ;;  %p163_p7 = scmp.lt.s32.totalorder %s1366_s21, 3 }
   0xa   : > { %p1455_p6 = por %p156_p3, %p42_p0  ;;  %s1368_s27 = smov [#allocation7]  }
   0xb   : > { %s1738_s24 = scalar_select %p1450_p4, 1, 0 }
   0xc   : > { %s1739_s25 = scalar_select %p1455_p6, 1, 0 }
   0xd   : > { %p1460_p8 = pnand %p988_p5, %p163_p7  ;;  %s175_s28 = sshll.u32 %s1368_s27, 4  ;;  %s1464_s28 = int_to_ptr.vmem [resolvable:$true] %s175_s28 }
   0xe   : > { %s1369_s30 = smov [#allocation9]   ;;  %s1210_s9 = scalar_lea.hbm %s1730_s1, 256 }
   0xf   : > { %p1117_p9 = pneg %p1460_p8  ;;  %s191_s6 = sshll.u32 %s1369_s30, 4  ;;  %s1475_s6 = int_to_ptr.vmem [resolvable:$true] %s191_s6 }
  0x10   : > { %p1211_p12 = scmp.ne.s32.totalorder %s1730_s1, %s1210_s9  ;;  %p1217_p5 = scmp.lt.u32.totalorder %s1210_s9, %s1730_s1 }
  0x11   : > { %p1471_p11 = pnand %p1117_p9, %p1735_p1 }
  0x13   : > { %p1212_p13 = pneg %p1471_p11 }
  0x15   : > { %p1213_p0 = pnand %p1212_p13, %p1211_p12 }
  0x17   : > { %p1214_p3 = pneg %p1213_p0 }
  0x19   : > { %p1219_p7 = pnand %p1217_p5, %p1214_p3 }
  0x1b   : > { %1222 = shalt.err (!%p1219_p7)
}
  0x1c   : > { %s1223_s14 = scalar_lea.vmem %s1464_s28, 256  ;;  %p1231_p2 = scmp.lt.s32.totalorder %s1464_s28, %s1464_s28 }
  0x1d   : > { %p1224_p9 = scmp.ne.s32.totalorder %s1464_s28, %s1223_s14  ;;  %p1232_p12 = scmp.lt.s32.totalorder %s1223_s14, %s1223_s14 }
  0x1f   : > { %p1226_p10 = pnand %p1224_p9, %p1212_p13  ;;  %p1233_p0 = por %p1232_p12, %p1231_p2 }
  0x21   : > { %p1227_p1 = pneg %p1226_p10 }
  0x23   : > { %p1234_p6 = pnand %p1233_p0, %p1227_p1 }
  0x25   : > { %1237 = shalt.err (!%p1234_p6)
}
  0x26   : > { %s1370_s15 = smov 64   ;;  %s1371_s16 = smov 4  }
  0x27   : > { %1120 = dma.hbm_to_vmem [thread:$0]  (!%p1471_p11), %s1730_s1, 256, %s1464_s28, [#allocation8], %s1370_s15, %s1370_s15, %s1371_s16  }
  0x28   : > { %s1238_s7 = scalar_lea.hbm %s1732_s3, 256 }
  0x29   : > { %p1239_p2 = scmp.ne.s32.totalorder %s1732_s3, %s1238_s7  ;;  %p1245_p10 = scmp.lt.u32.totalorder %s1238_s7, %s1732_s3 }
  0x2b   : > { %p1241_p1 = pnand %p1239_p2, %p1212_p13 }
  0x2d   : > { %p1242_p6 = pneg %p1241_p1 }
  0x2f   : > { %p1247_p3 = pnand %p1245_p10, %p1242_p6 }
  0x31   : > { %1250 = shalt.err (!%p1247_p3)
}
  0x32   : > { %s1251_s28 = scalar_lea.vmem %s1475_s6, 256  ;;  %p1259_p12 = scmp.lt.s32.totalorder %s1475_s6, %s1475_s6 }
  0x33   : > { %p1252_p5 = scmp.ne.s32.totalorder %s1475_s6, %s1251_s28  ;;  %p1260_p0 = scmp.lt.s32.totalorder %s1251_s28, %s1251_s28 }
  0x35   : > { %p1254_p7 = pnand %p1252_p5, %p1212_p13  ;;  %p1261_p2 = por %p1260_p0, %p1259_p12 }
  0x37   : > { %p1255_p9 = pneg %p1254_p7 }
  0x39   : > { %p1262_p1 = pnand %p1261_p2, %p1255_p9 }
  0x3b   : > { %1265 = shalt.err (!%p1262_p1)
}
  0x3c   : > { %1123 = dma.hbm_to_vmem [thread:$0]  (!%p1471_p11), %s1732_s3, 256, %s1475_s6, [#allocation8], %s1370_s15, %s1370_s15, %s1371_s16  }
  0x3d   : > { %s1530_s14 = sadd.s32 1, %s1366_s21   ;;  %s29_s29 = sadd.s32 1, %s1362_s20 }
  0x3e   : > { %s26_s17 = ssub.s32 %s1366_s21, %s1530_s14  ;;  %p36_p13 = scmp.ne.s32.totalorder %s1362_s20, %s1358_s19 }
  0x3f   : > { %p27_p6 = scmp.eq.s32.totalorder %s26_s17, 0  ;;  %p37_p10 = scmp.eq.s32.totalorder %s1366_s21, 0 }
  0x40   : > { %p1742_p3 = scmp.eq.s32.totalorder %s1441_s22, 1  ;;  %p1134_p7 = scmp.lt.s32.totalorder %s1366_s21, 2 }
  0x41   : > { %s1546_s27 = scalar_select %p27_p6, %s1362_s20, %s29_s29  }
  0x42   : > { %p1540_p5 = por %p1742_p3, %p36_p13  ;;  %p38_p9 = por %p37_p10, %p36_p13 }
  0x43   : > { %s208_s30 = sand.u32 1, %s1362_s20   ;;  %s993_s6 = sshll.u32 %s1366_s21, 6 }
  0x44   : > { %s1743_s23 = scalar_select %p1540_p5, 1, 0 }
  0x45   : > { %s992_s7 = sshll.u32 %s208_s30, 2  ;;  %s1553_s8 = scalar_lea.hbm %s1729_s0, %s993_s6 }
  0x46   : > { %s212_s9 = scalar_lea.vmem [#allocation4], %s992_s7  ;;  %p1557_p11 = pnand %p1134_p7, %p38_p9 }
  0x47   : > { %s219_s10 = sshll.u32 %s212_s9, 4  ;;  %s209_s28 = scalar_lea.sflag [#allocation5], %s208_s30  ;;  %s1555_s10 = int_to_ptr.vmem [resolvable:$true] %s219_s10 }
  0x48   : > { %s1266_s12 = scalar_lea.hbm %s1553_s8, 64  ;;  %p1268_p0 = pneg %p1557_p11 }
  0x49   : > { %p1267_p12 = scmp.ne.s32.totalorder %s1553_s8, %s1266_s12  ;;  %s1271_s17 = scalar_lea.hbm %s1729_s0, 128 }
  0x4a   : > { %p1272_p13 = scmp.lt.u32.totalorder %s1553_s8, %s1729_s0  ;;  %p1273_p6 = scmp.lt.u32.totalorder %s1271_s17, %s1266_s12 }
  0x4b   : > { %p1269_p2 = pnand %p1268_p0, %p1267_p12  ;;  %p1275_p3 = scmp.lt.u32.totalorder %s1266_s12, %s1553_s8 }
  0x4c   : > { %p1274_p10 = por %p1273_p6, %p1272_p13 }
  0x4d   : > { %p1270_p1 = pneg %p1269_p2 }
  0x4e   : > { %p1276_p7 = por %p1275_p3, %p1274_p10 }
  0x50   : > { %p1277_p9 = pnand %p1276_p7, %p1270_p1 }
  0x52   : > { %1280 = shalt.err (!%p1277_p9)
}
  0x53   : > { %s1281_s30 = scalar_lea.vmem %s1555_s10, 64  ;;  %s1372_s15 = smov [#allocation4]  }
  0x54   : > { %p1282_p12 = scmp.ne.s32.totalorder %s1555_s10, %s1281_s30  ;;  %s1286_s16 = sshll.u32 %s1372_s15, 4  ;;  %s1287_s16 = int_to_ptr.vmem [resolvable:$false] %s1286_s16 }
  0x55   : > { %s1288_s9 = scalar_lea.vmem %s1287_s16, 128  ;;  %p1289_p4 = scmp.lt.s32.totalorder %s1555_s10, %s1287_s16 }
  0x56   : > { %p1284_p2 = pnand %p1282_p12, %p1268_p0  ;;  %p1290_p13 = scmp.lt.s32.totalorder %s1288_s9, %s1281_s30 }
  0x58   : > { %p1285_p5 = pneg %p1284_p2  ;;  %p1291_p6 = por %p1290_p13, %p1289_p4 }
  0x5a   : > { %p1292_p10 = pnand %p1291_p6, %p1285_p5 }
  0x5c   : > { %1295 = shalt.err (!%p1292_p10)
}
  0x5d   : > { %1127 = dma.hbm_to_vmem [thread:$0]  (!%p1557_p11), %s1553_s8, 64, %s1555_s10, %s209_s28  }
  0x5e   : > { %228 = sbr.rel (%p1460_p8) target bundleno = 1614 (0x64e), region = 40  ;;  %s1589_s12 = sand.u32 (!%p1460_p8), 1, %s1358_s19  }
  0x5f   : > { %s995_s13 = sshll.u32 (!%p1460_p8), %s1589_s12, 2  ;;  %s231_s29 = scalar_lea.sflag (!%p1460_p8), [#allocation5], %s1589_s12 }
  0x60   : > { %s234_s17 = scalar_lea.vmem (!%p1460_p8), [#allocation4], %s995_s13  ;;  %p1745_p4 = scmp.ne.s32.totalorder (!%p1460_p8), %s1738_s24, 0 }
  0x65   : > { %1341 = dma.done.wait (%p1745_p4), %s231_s29, 64  }
  0x66   : > { %1343 = vsyncadd (%p1745_p4), %s231_s29, 4294967232  ;;  %p1746_p5 = scmp.eq.s32.totalorder %s1441_s22, 0 }
  0x68   : > { %1345 = dma.done.wait (%p1746_p5), [#allocation8], 512   ;;  %p1747_p11 = pmov %p1746_p5 }
  0x69   : > { %v1373_v0 = vmov 0.0   ;;  %vm1374_vm0 = vmmov 0   ;;  %v1190_v1 = vld [vmem:[#allocation7] sm:$0xff]   ;;  %v1191_v2 = vld [vmem:[#allocation7 + $0x8] sm:$0xff]   ;;  %v270_v3 = vld [vmem:[%s234_s17] sm:$0xf] }
  0x6a   : > { %1347 = vsyncadd (%p1747_p11), [#allocation8], 4294966784  ;;  %1041 = vmatprep.subr.bf16.mxu0 %v1373_v0  ;;  %1045 = vmatprep.mubr.msk.bf16.mxu0 %vm1374_vm0, %v1373_v0  ;;  %vm294_vm1 = vcmask 261120   ;;  %v999_v4 = vld [vmem:[%s1731_s2] ss:$0 sm:$0xff]  ;;  %vm338_vm2 = vcmask 785408  }
  0x6b   : > { %1049 = vmatprep.subr.bf16.mxu1 %v1373_v0  ;;  %1051 = vmatprep.mubr.msk.bf16.mxu1 %vm1374_vm0, %v1373_v0  ;;  %vm345_vm3 = vcmask 64512   ;;  %s1375_s8 = smov 88   ;;  %s1376_s10 = smov 96   ;;  %vm410_vm4 = vcmask 1043456   ;;  %vm573_vm5 = vcmask 130112   ;;  %vm693_vm6 = vcmask 195712  }
  0x6c   : > { %1042 = vmatpush3.bf16.msra.mxu0 %v1190_v1  ;;  %s1377_s11 = smov 112   ;;  %s1378_s28 = smov 120   ;;  %vm813_vm7 = vcmask 261312  }
  0x6d   : > { %1043 = vmatprep.subr.bf16.mxu0 %v1373_v0  ;;  %s1379_s7 = smov 104   ;;  %s1380_s6 = smov 80  }
  0x6e   : > { %s1381_s30 = smov 72   ;;  %s1382_s15 = smov 56  }
  0x6f   : > { %s1383_s16 = smov 64   ;;  %s1384_s9 = smov 40  }
  0x70   : > { %1044 = vmatpush3.bf16.msra.mxu0 %v1191_v2  ;;  %s1385_s13 = smov 48   ;;  %s1386_s29 = smov 8  }
  0x71   : > { %1055 = vmatprep.subr.bf16.mxu0 %v1373_v0  ;;  %s1387_s17 = smov 16   ;;  %s1388_s24 = smov 24  }
  0x72   : > { %s998_s26 = sshll.u32 %s1589_s12, 3  ;;  %p1748_p0 = scmp.ne.s32.totalorder %s1743_s23, 0 }
  0x73   : > { %1046 = vmatmul.mubr.msk.bf16.vlgmr.msra.gmra.mrb[0].mxu0 %vm294_vm1, %v270_v3 }
  0x74   : > { %1057 = vmatprep.mubr.msk.bf16.mxu0 %vm1374_vm0, %v1373_v0 }
 0x146   : > { %v332_v5 = vpop.f32.mrb[0].mxu0 }
 0x147   : > { %v333_v6 = vadd.f32 %v999_v4, %v332_v5  ;;  %v1047_v7 = vpop.f32.mrb[1].mxu0 }
 0x148   : > { %v335_v8 = vpop.f32.mrb[2].mxu0 }
 0x149   : > { %339 = vst.msk [vmem:[#allocation2] sm:$0xff] %vm338_vm2, %v333_v6  ;;  %v1048_v9 = vpop.f32.mrb[3].mxu0 }
 0x150   : > { %v455_v10 = vld [vmem:[#allocation2] sm:$0xff] }
 0x151   : > { %v1615_v11 = vpack.c.bf16 %v455_v10, %v455_v10 }
 0x153   : > { %458 = vrot.lane.b32.xlu1 %v1615_v11, %s1375_s8  ;;  %343 = vrot.lane.b32.xlu0 %v1615_v11, %s1376_s10  ;;  %v350_v12 = vsel %vm345_vm3, %v1615_v11, 0 }
 0x154   : > { %1050 = vmatpush3.bf16.xpose.msra.mxu1 %v350_v12 }
 0x155   : > { %1061 = vmatprep.subr.bf16.mxu1 %v1373_v0 }
 0x157   : > { %580 = vrot.lane.b32.xlu1 %v1615_v11, %s1377_s11  ;;  %460 = vrot.lane.b32.xlu0 %v1615_v11, %s1378_s28  ;;  %s1016_s11 = sshll.u32 %s1441_s22, 7  ;;  %s268_s28 = scalar_lea.vmem [#allocation10], %s998_s26 }
 0x15b   : > { %700 = vrot.lane.b32.xlu1 %v1615_v11, %s1379_s7  ;;  %578 = vrot.lane.b32.xlu0 %v1615_v11, %s1380_s6  ;;  %s898_s7 = sshll.u32 %s268_s28, 4  ;;  %s1687_s7 = int_to_ptr.vmem [resolvable:$true] %s898_s7 }
 0x15c   : > { %s1296_s22 = scalar_lea.vmem %s1687_s7, 128 }
 0x15d   : > { %p1297_p8 = scmp.ne.s32.totalorder %s1687_s7, %s1296_s22 }
 0x15f   : > { %698 = vrot.lane.b32.xlu0 %v1615_v11, %s1381_s30  ;;  %p1298_p1 = pnand %p1297_p8, %p1748_p0 }
 0x161   : > { %p1299_p3 = pneg %p1298_p1 }
 0x1c5   : > { %v344_v13 = vpop.permute.xlu0 %343  ;;  %v459_v14 = vpop.permute.xlu1 %458 }
 0x1c6   : > { %1052 = vmatmul.mubr.msk.bf16.vlgmr.msra.gmra.mrb[0].mxu1 %vm345_vm3, %v344_v13 }
 0x1c7   : > { %1063 = vmatprep.mubr.msk.bf16.mxu1 %vm1374_vm0, %v1373_v0 }
 0x1c9   : > { %v461_v15 = vpop.permute.xlu0 %460  ;;  %v581_v17 = vpop.permute.xlu1 %580 }
 0x1ca   : > { %v466_v16 = vsel %vm345_vm3, %v461_v15, 0  ;;  %v586_v18 = vsel %vm345_vm3, %v581_v17, 0 }
 0x1cb   : > { %1062 = vmatpush3.bf16.xpose.msra.mxu1 %v466_v16 }
 0x1cc   : > { %1073 = vmatprep.subr.bf16.mxu1 %v1373_v0 }
 0x1cd   : > { %v701_v19 = vpop.permute.xlu1 %700  ;;  %v579_v20 = vpop.permute.xlu0 %578 }
 0x1ce   : > { %v706_v21 = vsel %vm345_vm3, %v701_v19, 0 }
 0x1d1   : > { %v699_v22 = vpop.permute.xlu0 %698 }
 0x1d2   : > { %1064 = vmatmul.mubr.msk.bf16.vlgmr.msra.gmra.mrb[4].mxu1 %vm345_vm3, %v459_v14 }
 0x1d3   : > { %1074 = vmatpush3.bf16.xpose.msra.mxu1 %v586_v18  ;;  %1075 = vmatprep.mubr.msk.bf16.mxu1 %vm1374_vm0, %v1373_v0 }
 0x1d4   : > { %1085 = vmatprep.subr.bf16.mxu1 %v1373_v0 }
 0x1da   : > { %1076 = vmatmul.mubr.msk.bf16.vlgmr.msra.gmra.mrb[8].mxu1 %vm345_vm3, %v579_v20 }
 0x1db   : > { %1086 = vmatpush3.bf16.xpose.msra.mxu1 %v706_v21  ;;  %1087 = vmatprep.mubr.msk.bf16.mxu1 %vm1374_vm0, %v1373_v0 }
 0x1dc   : > { %1097 = vmatprep.subr.bf16.mxu1 %v1373_v0 }
 0x1e2   : > { %1088 = vmatmul.mubr.msk.bf16.vlgmr.msra.gmra.mrb[12].mxu1 %vm345_vm3, %v699_v22 }
 0x1e3   : > { %1101 = vmatprep.mubr.msk.bf16.mxu1 %vm1374_vm0, %v1373_v0 }
 0x299   : > { %v386_v23 = vpop.f32.mrb[0].mxu1 }
 0x29a   : > { %v1053_v24 = vpop.f32.mrb[1].mxu1  ;;  %v392_v25 = vsel %vm345_vm3, %v386_v23, -inf }
 0x29b   : > { %393 = vmax.xlane.f32.xlu1 %v392_v25  ;;  %v389_v26 = vpop.f32.mrb[2].mxu1 }
 0x29c   : > { %v1054_v27 = vpop.f32.mrb[3].mxu1 }
 0x2a5   : > { %v502_v28 = vpop.f32.mrb[4].mxu1 }
 0x2a6   : > { %v1065_v29 = vpop.f32.mrb[5].mxu1  ;;  %v508_v30 = vsel %vm345_vm3, %v502_v28, -inf }
 0x2a7   : > { %509 = vmax.xlane.f32.xlu0 %v508_v30  ;;  %v505_v31 = vpop.f32.mrb[6].mxu1 }
 0x2a8   : > { %v1066_v32 = vpop.f32.mrb[7].mxu1 }
 0x2ad   : > { %v622_v33 = vpop.f32.mrb[8].mxu1 }
 0x2ae   : > { %v1077_v34 = vpop.f32.mrb[9].mxu1  ;;  %v628_v35 = vsel %vm345_vm3, %v622_v33, -inf }
 0x2af   : > { %629 = vmax.xlane.f32.xlu0 %v628_v35  ;;  %v625_v36 = vpop.f32.mrb[10].mxu1 }
 0x2b0   : > { %v1078_v37 = vpop.f32.mrb[11].mxu1  ;;  %v1192_v36 = vld [vmem:[#allocation9] sm:$0xff]  }
 0x2b1   : > { %1098 = vmatpush3.bf16.msra.mxu1 %v1192_v36  ;;  %v1193_v37 = vld [vmem:[#allocation9 + $0x8] sm:$0xff]  }
 0x2b2   : > { %1099 = vmatprep.subr.bf16.mxu1 %v1373_v0 }
 0x2b5   : > { %v742_v38 = vpop.f32.mrb[12].mxu1  ;;  %1100 = vmatpush3.bf16.msra.mxu1 %v1193_v37 }
 0x2b6   : > { %v1089_v39 = vpop.f32.mrb[13].mxu1  ;;  %v748_v40 = vsel %vm345_vm3, %v742_v38, -inf }
 0x2b7   : > { %749 = vmax.xlane.f32.xlu1 %v748_v40  ;;  %v745_v41 = vpop.f32.mrb[14].mxu1 }
 0x2b8   : > { %v1090_v42 = vpop.f32.mrb[15].mxu1 }
 0x328   : > { %v394_v43 = vpop.xlane.xlu1 %393 }
 0x329   : > { %v395_v44 = vsub.f32 %v386_v23, %v394_v43 }
 0x32b   : > { %v396_v45 = vmul.f32 1.442695, %v395_v44 }
 0x32d   : > { %1194 = vpow2.f32 %v396_v45 }
 0x334   : > { %v510_v46 = vpop.xlane.xlu0 %509 }
 0x335   : > { %v511_v47 = vsub.f32 %v502_v28, %v510_v46 }
 0x337   : > { %v1195_v48 = vpop.eup %1194  ;;  %v512_v49 = vmul.f32 1.442695, %v511_v47 }
 0x338   : > { %v398_v50 = vsel %vm345_vm3, %v1195_v48, 0.0 }
 0x339   : > { %1196 = vpow2.f32 %v512_v49  ;;  %399 = vadd.xlane.f32.xlu0 %v398_v50  ;;  %v1011_v50 = vld [vmem:[%s1733_s4] ss:$0 sm:$0xff] }
 0x33c   : > { %v630_v51 = vpop.xlane.xlu0 %629 }
 0x33d   : > { %v631_v52 = vsub.f32 %v622_v33, %v630_v51 }
 0x33f   : > { %v632_v53 = vmul.f32 1.442695, %v631_v52 }
 0x341   : > { %1198 = vpow2.f32 %v632_v53 }
 0x343   : > { %v1197_v54 = vpop.eup %1196 }
 0x344   : > { %v514_v55 = vsel %vm345_vm3, %v1197_v54, 0.0  ;;  %v750_v58 = vpop.xlane.xlu1 %749 }
 0x345   : > { %515 = vadd.xlane.f32.xlu1 %v514_v55  ;;  %v751_v59 = vsub.f32 %v742_v38, %v750_v58 }
 0x347   : > { %v752_v60 = vmul.f32 1.442695, %v751_v59 }
 0x349   : > { %1200 = vpow2.f32 %v752_v60 }
 0x34b   : > { %v1199_v56 = vpop.eup %1198 }
 0x34c   : > { %v634_v57 = vsel %vm345_vm3, %v1199_v56, 0.0 }
 0x34d   : > { %635 = vadd.xlane.f32.xlu0 %v634_v57 }
 0x353   : > { %v1201_v61 = vpop.eup %1200 }
 0x354   : > { %v754_v62 = vsel %vm345_vm3, %v1201_v61, 0.0 }
 0x356   : > { %521 = vrot.lane.b32.xlu1 %v1615_v11, %s1382_s15  ;;  %s1685_s15 = scalar_lea.hbm %s1734_s5, %s1016_s11 }
 0x363   : > { %405 = vrot.lane.b32.xlu0 %v1615_v11, %s1383_s16  ;;  %s885_s16 = scalar_lea.sflag [#allocation6], %s1589_s12 }
 0x367   : > { %761 = vrot.lane.b32.xlu0 %v1615_v11, %s1384_s9  ;;  %s1389_s9 = smov [#allocation10]  }
 0x37a   : > { %755 = vadd.xlane.f32.xlu1 %v754_v62 }
 0x38b   : > { %641 = vrot.lane.b32.xlu1 %v1615_v11, %s1385_s13  ;;  %s1300_s13 = sshll.u32 %s1389_s9, 4  ;;  %s1301_s13 = int_to_ptr.vmem [resolvable:$false] %s1300_s13 }
 0x38c   : > { %p1303_p7 = scmp.lt.s32.totalorder %s1687_s7, %s1301_s13 }
 0x3c6   : > { %v400_v63 = vpop.xlane.xlu0 %399 }
 0x3c7   : > { %1202 = vrcp.f32 %v400_v63 }
 0x3d1   : > { %v1203_v2 = vpop.eup %1202 }
 0x3d2   : > { %v516_v1 = vpop.xlane.xlu1 %515  ;;  %v402_v3 = vmul.f32 0.35355338, %v1203_v2 }
 0x3d3   : > { %1204 = vrcp.f32 %v516_v1 }
 0x3d4   : > { %v403_v5 = vmul.f32 %v1195_v48, %v402_v3 }
 0x3d6   : > { %v522_v9 = vpop.permute.xlu1 %521  ;;  %v404_v10 = vpack.c.bf16 %v403_v5, %v403_v5 }
 0x3d7   : > { %v527_v11 = vsel %vm410_vm4, %v522_v9, 0 }
 0x3da   : > { %v636_v4 = vpop.xlane.xlu0 %635 }
 0x3db   : > { %1206 = vrcp.f32 %v636_v4 }
 0x3dd   : > { %v1205_v6 = vpop.eup %1204 }
 0x3de   : > { %v406_v7 = vpop.permute.xlu0 %405  ;;  %v518_v12 = vmul.f32 0.35355338, %v1205_v6 }
 0x3df   : > { %v412_v8 = vsel %vm410_vm4, %v406_v7, 0 }
 0x3e0   : > { %1056 = vmatpush3.bf16.msra.mxu0 %v412_v8  ;;  %v519_v13 = vmul.f32 %v1197_v54, %v518_v12 }
 0x3e1   : > { %1067 = vmatprep.subr.bf16.mxu0 %v1373_v0 }
 0x3e2   : > { %v520_v14 = vpack.c.bf16 %v519_v13, %v519_v13  ;;  %v762_v21 = vpop.permute.xlu0 %761 }
 0x3e3   : > { %1058 = vmatmul.mubr.msk.bf16.vlgmr.msra.gmra.mrb[4].mxu0 %vm345_vm3, %v404_v10  ;;  %v767_v23 = vsel %vm410_vm4, %v762_v21, 0 }
 0x3e4   : > { %1068 = vmatpush3.bf16.msra.mxu0 %v527_v11  ;;  %1069 = vmatprep.mubr.msk.bf16.mxu0 %vm1374_vm0, %v1373_v0 }
 0x3e5   : > { %1079 = vmatprep.subr.bf16.mxu0 %v1373_v0  ;;  %v1207_v15 = vpop.eup %1206 }
 0x3e6   : > { %v638_v16 = vmul.f32 0.35355338, %v1207_v15 }
 0x3e8   : > { %v639_v18 = vmul.f32 %v1199_v56, %v638_v16 }
 0x3ea   : > { %v640_v22 = vpack.c.bf16 %v639_v18, %v639_v18 }
 0x3eb   : > { %1070 = vmatmul.mubr.msk.bf16.vlgmr.msra.gmra.mrb[8].mxu0 %vm345_vm3, %v520_v14 }
 0x3ec   : > { %1081 = vmatprep.mubr.msk.bf16.mxu0 %vm1374_vm0, %v1373_v0 }
 0x407   : > { %v756_v17 = vpop.xlane.xlu1 %755 }
 0x408   : > { %1208 = vrcp.f32 %v756_v17 }
 0x40b   : > { %v642_v19 = vpop.permute.xlu1 %641 }
 0x40c   : > { %v647_v20 = vsel %vm410_vm4, %v642_v19, 0 }
 0x40d   : > { %1080 = vmatpush3.bf16.msra.mxu0 %v647_v20 }
 0x40e   : > { %1091 = vmatprep.subr.bf16.mxu0 %v1373_v0 }
 0x410   : > { %1082 = vmatmul.mubr.msk.bf16.vlgmr.msra.gmra.mrb[12].mxu0 %vm345_vm3, %v640_v22 }
 0x411   : > { %1092 = vmatpush3.bf16.msra.mxu0 %v767_v23  ;;  %1093 = vmatprep.mubr.msk.bf16.mxu0 %vm1374_vm0, %v1373_v0 }
 0x412   : > { %v1209_v24 = vpop.eup %1208 }
 0x413   : > { %v758_v25 = vmul.f32 0.35355338, %v1209_v24 }
 0x415   : > { %v759_v26 = vmul.f32 %v1201_v61, %v758_v25 }
 0x417   : > { %v760_v27 = vpack.c.bf16 %v759_v26, %v759_v26 }
 0x419   : > { %1094 = vmatmul.mubr.msk.bf16.vlgmr.msra.gmra.mrb[16].mxu0 %vm345_vm3, %v760_v27 }
 0x4b6   : > { %v448_v28 = vpop.f32.mrb[4].mxu0 }
 0x4b7   : > { %454 = vst.msk [vmem:[#allocation3] sm:$0xff] %vm345_vm3, %v448_v28  ;;  %v1059_v29 = vpop.f32.mrb[5].mxu0 }
 0x4b8   : > { %v451_v30 = vpop.f32.mrb[6].mxu0 }
 0x4b9   : > { %v1060_v31 = vpop.f32.mrb[7].mxu0 }
 0x4be   : > { %v563_v32 = vpop.f32.mrb[8].mxu0 }
 0x4bf   : > { %570 = vrot.lane.b32.xlu1 %v563_v32, %s1386_s29  ;;  %v1071_v33 = vpop.f32.mrb[9].mxu0  ;;  %s1302_s29 = scalar_lea.vmem %s1301_s13, 256 }
 0x4c0   : > { %v566_v34 = vpop.f32.mrb[10].mxu0  ;;  %p1304_p9 = scmp.lt.s32.totalorder %s1302_s29, %s1296_s22 }
 0x4c1   : > { %v1072_v35 = vpop.f32.mrb[11].mxu0 }
 0x4c2   : > { %p1305_p12 = por %p1304_p9, %p1303_p7 }
 0x4c4   : > { %p1306_p2 = pnand %p1305_p12, %p1299_p3 }
 0x4e3   : > { %v683_v38 = vpop.f32.mrb[12].mxu0 }
 0x4e4   : > { %690 = vrot.lane.b32.xlu0 %v683_v38, %s1387_s17  ;;  %v1083_v39 = vpop.f32.mrb[13].mxu0 }
 0x4e5   : > { %v686_v40 = vpop.f32.mrb[14].mxu0 }
 0x4e6   : > { %v1084_v41 = vpop.f32.mrb[15].mxu0 }
 0x4ec   : > { %v803_v42 = vpop.f32.mrb[16].mxu0 }
 0x4ed   : > { %810 = vrot.lane.b32.xlu1 %v803_v42, %s1388_s24  ;;  %v1095_v43 = vpop.f32.mrb[17].mxu0 }
 0x4ee   : > { %v806_v44 = vpop.f32.mrb[18].mxu0 }
 0x4ef   : > { %v1096_v45 = vpop.f32.mrb[19].mxu0 }
 0x531   : > { %v571_v46 = vpop.permute.xlu1 %570 }
 0x532   : > { %574 = vst.msk [vmem:[#allocation3] sm:$0xff] %vm573_vm5, %v571_v46 }
 0x556   : > { %v691_v47 = vpop.permute.xlu0 %690 }
 0x557   : > { %694 = vst.msk [vmem:[#allocation3] sm:$0xff] %vm693_vm6, %v691_v47 }
 0x55f   : > { %v811_v0 = vpop.permute.xlu1 %810 }
 0x560   : > { %814 = vst.msk [vmem:[#allocation3] sm:$0xff] %vm813_vm7, %v811_v0 }
 0x567   : > { %v815_v48 = vld [vmem:[#allocation3] sm:$0xff] }
 0x568   : > { %v816_v49 = vpack.c.bf16 %v815_v48, %v815_v48 }
 0x56a   : > { %1102 = vmatmul.mubr.msk.bf16.vlgmr.msra.gmra.mrb[16].mxu1 %vm294_vm1, %v816_v49 }
 0x63d   : > { %v877_v51 = vpop.f32.mrb[16].mxu1 }
 0x63e   : > { %v878_v52 = vadd.f32 %v1011_v50, %v877_v51  ;;  %v1103_v53 = vpop.f32.mrb[17].mxu1 }
 0x63f   : > { %v880_v54 = vpop.f32.mrb[18].mxu1 }
 0x640   : > { %883 = vst [vmem:[%s268_s28] sm:$0xff] %v878_v52  ;;  %v1104_v55 = vpop.f32.mrb[19].mxu1 }
 0x641   : > { %1309 = shalt.err (!%p1306_p2)
}
 0x642   : > { %s1310_s12 = scalar_lea.hbm %s1685_s15, 128  ;;  %s1314_s26 = scalar_lea.hbm %s1734_s5, 256 }
 0x643   : > { %p1311_p13 = scmp.ne.s32.totalorder %s1685_s15, %s1310_s12  ;;  %p1315_p4 = scmp.lt.u32.totalorder %s1685_s15, %s1734_s5 }
 0x644   : > { %p1316_p5 = scmp.lt.u32.totalorder %s1314_s26, %s1310_s12  ;;  %p1318_p8 = scmp.lt.u32.totalorder %s1310_s12, %s1685_s15 }
 0x645   : > { %p1312_p6 = pnand %p1311_p13, %p1748_p0 }
 0x646   : > { %p1317_p11 = por %p1316_p5, %p1315_p4 }
 0x647   : > { %p1313_p10 = pneg %p1312_p6 }
 0x648   : > { %p1319_p1 = por %p1318_p8, %p1317_p11 }
 0x64a   : > { %p1320_p3 = pnand %p1319_p1, %p1313_p10 }
 0x64c   : > { %1323 = shalt.err (!%p1320_p3)
}
 0x64d   : > { %1115 = dma.vmem_to_hbm [thread:$0]  (%p1748_p0), %s1687_s7, 128, %s1685_s15, %s885_s16  }
 0x64e PF: > { %s910_s11 = sand.u32 1, %s1354_s18   ;;  %p1749_p7 = scmp.ne.s32.totalorder %s1739_s25, 0 }
 0x64f   : > { %p1750_p9 = scmp.ge.s32.totalorder %s1366_s21, 2  ;;  %s911_s28 = scalar_lea.sflag [#allocation6], %s910_s11 }
 0x651   : > { %p1129_p12 = pnand %p1750_p9, %p1749_p7 }
 0x653   : > { %1349 = dma.done.wait (!%p1129_p12), %s911_s28, 128  }
 0x654   : > { %1351 = vsyncadd (!%p1129_p12), %s911_s28, 4294967168  ;;  %p19_p2 = scmp.ge.s32.totalorder %s1530_s14, 4   ;;  %s1751_s18 = smov %s1358_s19 }
 0x655   : > { %s1752_s19 = smov %s1362_s20  ;;  %s1753_s20 = smov %s1546_s27 }
 0x656   : > { %s1754_s21 = smov %s1530_s14  ;;  %21 = sbr.rel (!%p19_p2) target bundleno = 6 (0x6), region = 93 }
 0x65d   :  { %916 = vsyncpa [#allocation5], 1 }
 0x65e   :  { %918 = vsyncpa [#allocation5 + $0x1], 1 }
 0x65f   :  { %919 = vsyncpa [#allocation8], 1 }
 0x660   :  { %920 = vsyncpa [#allocation6], 1 }
 0x661   :  { %922 = vsyncpa [#allocation6 + $0x1], 1 }

</bundles_post_ra>
